<compile_context>
chip_gen: v7x
topology: tpu7x:2x2x1
jax: 0.10.0
libtpu: 0.0.40
codegen_flags: <defaults>
</compile_context>

<pallas_src>
import functools

import jax
import jax.numpy as jnp
from jax.experimental import pallas as pl
from jax.experimental.pallas import tpu as pltpu


def _frame_avg_pool_kernel(x_ref, w_ref, b_ref, pt_ref, pos_ref, o_ref, *, num_clips):
    """Unified FrameAvgPool forward (eval mode).

    x_ref:   (B, C, T)        visual input, original PyTorch NCW layout
    w_ref:   (H, C)           1x1 Conv1d weight
    b_ref:   (H, 1)           Conv1d bias
    pt_ref:  (B*T, B*NC)      block-diagonal pooling matrix, entries 1/kernel_size
    pos_ref: (H, NC)          positional embedding, pre-transposed in the wrapper
    o_ref:   (B, H, NC)       output, PyTorch layout
    """
    B = x_ref.shape[0]
    # Fuse batch into the lane dimension: B cheap lane-concats -> (C, B*T).
    x2 = jnp.concatenate([x_ref[bi] for bi in range(B)], axis=1)            # (C, B*T)
    # Single 1x1-conv matmul for the whole batch; bias broadcast emitted once.
    h = jnp.dot(w_ref[...], x2, preferred_element_type=jnp.float32)         # (H, B*T)
    h = jnp.maximum(h + jnp.broadcast_to(b_ref[...], h.shape), 0.0)         # bias + ReLU
    # AvgPool1d (any stride/kernel) as one block-diagonal matmul; 1/k is inside pt, so the
    # rounding order matches PyTorch's mean-after-relu exactly.
    pooled = jnp.dot(h, pt_ref[...], preferred_element_type=jnp.float32)    # (H, B*NC)
    pos = pos_ref[...]                                                       # (H, NC)
    # TODO(synk): Dropout(p=0.1) from LearnPositionalEncoding is identity in eval mode.
    for bi in range(B):  # static contiguous lane slices; B is tiny
        o_ref[bi] = (pooled[:, bi * num_clips:(bi + 1) * num_clips] + pos).astype(o_ref.dtype)


@functools.partial(jax.jit, static_argnames=("kernel_size", "stride"))
def frame_avg_pool(visual_input, conv_w, conv_b, pos_w, *, kernel_size, stride):
    """visual_input: (B, C, T) float32 (PyTorch NCW).  conv_w: (H, C, 1), conv_b: (H,),
    pos_w: (NUM_CLIPS, H).  Returns (B, H, NUM_CLIPS), matching FrameAvgPool.forward."""
    B, C, T = visual_input.shape
    H = conv_w.shape[0]
    num_clips = (T - kernel_size) // stride + 1
    assert pos_w.shape == (num_clips, H), (pos_w.shape, num_clips, H)

    # Parameter prep (constant under jit): squeeze the k=1 conv tap, pre-transpose pos_w,
    # build the block-diagonal pooling matrix with the 1/kernel_size scale folded in.
    w_hc = conv_w.reshape(H, C)
    b_h1 = conv_b.reshape(H, 1)
    pos_hn = jnp.transpose(pos_w, (1, 0))                                    # (H, NC)

    b_row = (jnp.arange(B * T, dtype=jnp.int32) // T)[:, None]
    t_row = (jnp.arange(B * T, dtype=jnp.int32) % T)[:, None]
    b_col = (jnp.arange(B * num_clips, dtype=jnp.int32) // num_clips)[None, :]
    j_col = (jnp.arange(B * num_clips, dtype=jnp.int32) % num_clips)[None, :]
    start = j_col * stride
    pool_t = ((b_row == b_col) & (t_row >= start) & (t_row < start + kernel_size))
    pool_t = pool_t.astype(jnp.float32) * (1.0 / kernel_size)                # (B*T, B*NC)

    out_shape = jax.ShapeDtypeStruct((B, H, num_clips), jnp.float32)
    flops = 2 * H * C * (B * T) + 2 * H * (B * T) * (B * num_clips)
    bytes_accessed = 4 * (B * C * T + H * C + H + (B * T) * (B * num_clips)
                          + H * num_clips + B * H * num_clips)

    kernel = functools.partial(_frame_avg_pool_kernel, num_clips=num_clips)
    return pl.pallas_call(
        kernel,
        out_shape=out_shape,
        grid_spec=pl.GridSpec(
            grid=(1,),  # single step: whole working set fits VMEM, no pipeline overhead
            in_specs=[
                pl.BlockSpec((B, C, T), lambda i: (0, 0, 0)),
                pl.BlockSpec((H, C), lambda i: (0, 0)),
                pl.BlockSpec((H, 1), lambda i: (0, 0)),
                pl.BlockSpec((B * T, B * num_clips), lambda i: (0, 0)),
                pl.BlockSpec((H, num_clips), lambda i: (0, 0)),
            ],
            out_specs=pl.BlockSpec((B, H, num_clips), lambda i: (0, 0, 0)),
        ),
        compiler_params=pltpu.CompilerParams(dimension_semantics=("arbitrary",)),
        cost_estimate=pl.CostEstimate(
            flops=flops, transcendentals=0, bytes_accessed=bytes_accessed),
    )(visual_input, w_hc, b_h1, pool_t, pos_hn)


def _reference(visual_input, conv_w, conv_b, pos_w, *, kernel_size, stride):
    # Pure-JAX reference of the PyTorch forward for validation.
    num_clips = (visual_input.shape[2] - kernel_size) // stride + 1
    h = jnp.einsum("bct,hc->bht", visual_input, conv_w[:, :, 0]) + conv_b[None, :, None]
    h = jnp.maximum(h, 0.0)
    windows = jnp.stack(
        [h[:, :, j * stride: j * stride + kernel_size].mean(axis=-1) for j in range(num_clips)],
        axis=-1,
    )  # (B, H, NC)
    return windows + jnp.transpose(pos_w, (1, 0))[None, :, :]


if __name__ == "__main__":
    # cfg: INPUT_SIZE=32, HIDDEN_SIZE=32, KERNEL_SIZE=2, STRIDE=2, USE_POSITION=True,
    #      NUM_CLIPS=8; input sequence length T=16, batch B=2.
    B, C, H, T = 2, 32, 32, 16
    KERNEL_SIZE, STRIDE = 2, 2
    NUM_CLIPS = (T - KERNEL_SIZE) // STRIDE + 1  # 8

    key = jax.random.PRNGKey(0)
    k_x, k_w, k_b, k_p1, k_p2 = jax.random.split(key, 5)
    visual_input = jax.random.normal(k_x, (B, C, T), dtype=jnp.float32)
    conv_w = jax.random.normal(k_w, (H, C, 1), dtype=jnp.float32) * 0.1
    conv_b = jax.random.normal(k_b, (H,), dtype=jnp.float32) * 0.1
    pos_w = jax.random.uniform(k_p1, (NUM_CLIPS, H), dtype=jnp.float32)  # nn.init.uniform_

    out = frame_avg_pool(
        visual_input, conv_w, conv_b, pos_w, kernel_size=KERNEL_SIZE, stride=STRIDE
    )
    out = jax.block_until_ready(out)
    ref = _reference(
        visual_input, conv_w, conv_b, pos_w, kernel_size=KERNEL_SIZE, stride=STRIDE
    )
    assert out.shape == (B, H, NUM_CLIPS), out.shape
    assert jnp.allclose(out, ref, atol=1e-5, rtol=1e-5), float(jnp.abs(out - ref).max())

    # Same unified kernel also handles overlapping windows (stride != kernel_size).
    K2, S2 = 4, 2
    NC2 = (T - K2) // S2 + 1  # 7
    pos_w2 = jax.random.uniform(k_p2, (NC2, H), dtype=jnp.float32)
    out2 = jax.block_until_ready(
        frame_avg_pool(visual_input, conv_w, conv_b, pos_w2, kernel_size=K2, stride=S2)
    )
    ref2 = _reference(visual_input, conv_w, conv_b, pos_w2, kernel_size=K2, stride=S2)
    assert out2.shape == (B, H, NC2), out2.shape
    assert jnp.allclose(out2, ref2, atol=1e-5, rtol=1e-5), float(jnp.abs(out2 - ref2).max())

    print("KERNEL_OK")
</pallas_src>

<mosaic_0001>
module attributes {stable_mosaic.version = 11 : i64} {
  func.func @_frame_avg_pool_kernel(%arg0: i32, %arg1: memref<2x32x16xf32, #tpu.memory_space<vmem>>, %arg2: memref<32x32xf32, #tpu.memory_space<vmem>>, %arg3: memref<32x1xf32, #tpu.memory_space<vmem>>, %arg4: memref<32x16xf32, #tpu.memory_space<vmem>>, %arg5: memref<32x8xf32, #tpu.memory_space<vmem>>, %arg6: memref<2x32x8xf32, #tpu.memory_space<vmem>>) attributes {dimension_semantics = [#tpu.dimension_semantics<arbitrary>], iteration_bounds = array<i64: 1>, scalar_prefetch = 0 : i64, scratch_operands = 0 : i64, tpu.core_type = #tpu.core_type<tc>, window_params = [{pipeline_mode = #tpu.pipeline_mode<synchronous>, transform_indices = @transform_0, window_bounds = array<i64: 2, 32, 16>}, {pipeline_mode = #tpu.pipeline_mode<synchronous>, transform_indices = @transform_1, window_bounds = array<i64: 32, 32>}, {pipeline_mode = #tpu.pipeline_mode<synchronous>, transform_indices = @transform_2, window_bounds = array<i64: 32, 1>}, {pipeline_mode = #tpu.pipeline_mode<synchronous>, transform_indices = @transform_3, window_bounds = array<i64: 32, 16>}, {pipeline_mode = #tpu.pipeline_mode<synchronous>, transform_indices = @transform_4, window_bounds = array<i64: 32, 8>}, {pipeline_mode = #tpu.pipeline_mode<synchronous>, transform_indices = @transform_5, window_bounds = array<i64: 2, 32, 8>}]} {
    %c0 = arith.constant 0 : index
    %c0_0 = arith.constant 0 : index
    %c0_1 = arith.constant 0 : index
    %0 = vector.load %arg1[%c0, %c0_0, %c0_1] : memref<2x32x16xf32, #tpu.memory_space<vmem>>, vector<1x32x16xf32>
    %1 = vector.shape_cast %0 : vector<1x32x16xf32> to vector<32x16xf32>
    %c1 = arith.constant 1 : index
    %c0_2 = arith.constant 0 : index
    %c0_3 = arith.constant 0 : index
    %2 = vector.load %arg1[%c1, %c0_2, %c0_3] : memref<2x32x16xf32, #tpu.memory_space<vmem>>, vector<1x32x16xf32>
    %3 = vector.shape_cast %2 : vector<1x32x16xf32> to vector<32x16xf32>
    %4 = tpu.concatenate %1, %3 in 1 : vector<32x16xf32>, vector<32x16xf32> -> vector<32x32xf32>
    %c0_4 = arith.constant 0 : index
    %c0_5 = arith.constant 0 : index
    %5 = vector.load %arg2[%c0_4, %c0_5] : memref<32x32xf32, #tpu.memory_space<vmem>>, vector<32x32xf32>
    %cst = arith.constant dense<0.000000e+00> : vector<32x32xf32>
    %6 = tpu.matmul %5, %4, %cst {dimension_numbers = #tpu.dot_dimension_numbers<[1], [0], [0], [1], [0, 0, 1, 1], [], []>} : vector<32x32xf32>, vector<32x32xf32>, vector<32x32xf32> -> vector<32x32xf32>
    %c0_6 = arith.constant 0 : index
    %c0_7 = arith.constant 0 : index
    %7 = vector.load %arg3[%c0_6, %c0_7] : memref<32x1xf32, #tpu.memory_space<vmem>>, vector<32x1xf32>
    %8 = vector.shape_cast %7 : vector<32x1xf32> to vector<32x1xf32>
    %9 = vector.broadcast %8 : vector<32x1xf32> to vector<32x32xf32>
    %10 = arith.addf %6, %9 : vector<32x32xf32>
    %cst_8 = arith.constant 0.000000e+00 : f32
    %11 = vector.broadcast %cst_8 : f32 to vector<32x32xf32>
    %12 = arith.maximumf %10, %11 : vector<32x32xf32>
    %c0_9 = arith.constant 0 : index
    %c0_10 = arith.constant 0 : index
    %13 = vector.load %arg4[%c0_9, %c0_10] : memref<32x16xf32, #tpu.memory_space<vmem>>, vector<32x16xf32>
    %cst_11 = arith.constant dense<0.000000e+00> : vector<32x16xf32>
    %14 = tpu.matmul %12, %13, %cst_11 {dimension_numbers = #tpu.dot_dimension_numbers<[1], [0], [0], [1], [0, 0, 1, 1], [], []>} : vector<32x32xf32>, vector<32x16xf32>, vector<32x16xf32> -> vector<32x16xf32>
    %c0_12 = arith.constant 0 : index
    %c0_13 = arith.constant 0 : index
    %15 = vector.load %arg5[%c0_12, %c0_13] : memref<32x8xf32, #tpu.memory_space<vmem>>, vector<32x8xf32>
    %16 = vector.extract_strided_slice %14 {offsets = [0, 0], sizes = [32, 8], strides = [1, 1]} : vector<32x16xf32> to vector<32x8xf32>
    %17 = arith.addf %16, %15 : vector<32x8xf32>
    %c0_14 = arith.constant 0 : index
    %c0_15 = arith.constant 0 : index
    %c0_16 = arith.constant 0 : index
    %18 = vector.load %arg6[%c0_14, %c0_15, %c0_16] : memref<2x32x8xf32, #tpu.memory_space<vmem>>, vector<1x32x8xf32>
    %19 = vector.shape_cast %18 : vector<1x32x8xf32> to vector<32x8xf32>
    %20 = vector.shape_cast %17 : vector<32x8xf32> to vector<1x32x8xf32>
    tpu.vector_store %arg6[%c0_14, %c0_15, %c0_16], %20 {strides = array<i32>} : memref<2x32x8xf32, #tpu.memory_space<vmem>>, vector<1x32x8xf32>,
    %21 = vector.extract_strided_slice %14 {offsets = [0, 8], sizes = [32, 8], strides = [1, 1]} : vector<32x16xf32> to vector<32x8xf32>
    %22 = arith.addf %21, %15 : vector<32x8xf32>
    %c1_17 = arith.constant 1 : index
    %c0_18 = arith.constant 0 : index
    %c0_19 = arith.constant 0 : index
    %23 = vector.load %arg6[%c1_17, %c0_18, %c0_19] : memref<2x32x8xf32, #tpu.memory_space<vmem>>, vector<1x32x8xf32>
    %24 = vector.shape_cast %23 : vector<1x32x8xf32> to vector<32x8xf32>
    %25 = vector.shape_cast %22 : vector<32x8xf32> to vector<1x32x8xf32>
    tpu.vector_store %arg6[%c1_17, %c0_18, %c0_19], %25 {strides = array<i32>} : memref<2x32x8xf32, #tpu.memory_space<vmem>>, vector<1x32x8xf32>,
    return
  }
  func.func @transform_0(%arg0: i32) -> (i32, i32, i32) {
    %c0_i32 = arith.constant 0 : i32
    %c0_i32_0 = arith.constant 0 : i32
    %c0_i32_1 = arith.constant 0 : i32
    %c0_i32_2 = arith.constant 0 : i32
    return %c0_i32, %c0_i32_0, %c0_i32_1 : i32, i32, i32
  }
  func.func @transform_1(%arg0: i32) -> (i32, i32) {
    %c0_i32 = arith.constant 0 : i32
    %c0_i32_0 = arith.constant 0 : i32
    %c0_i32_1 = arith.constant 0 : i32
    return %c0_i32, %c0_i32_0 : i32, i32
  }
  func.func @transform_2(%arg0: i32) -> (i32, i32) {
    %c0_i32 = arith.constant 0 : i32
    %c0_i32_0 = arith.constant 0 : i32
    %c0_i32_1 = arith.constant 0 : i32
    return %c0_i32, %c0_i32_0 : i32, i32
  }
  func.func @transform_3(%arg0: i32) -> (i32, i32) {
    %c0_i32 = arith.constant 0 : i32
    %c0_i32_0 = arith.constant 0 : i32
    %c0_i32_1 = arith.constant 0 : i32
    return %c0_i32, %c0_i32_0 : i32, i32
  }
  func.func @transform_4(%arg0: i32) -> (i32, i32) {
    %c0_i32 = arith.constant 0 : i32
    %c0_i32_0 = arith.constant 0 : i32
    %c0_i32_1 = arith.constant 0 : i32
    return %c0_i32, %c0_i32_0 : i32, i32
  }
  func.func @transform_5(%arg0: i32) -> (i32, i32, i32) {
    %c0_i32 = arith.constant 0 : i32
    %c0_i32_0 = arith.constant 0 : i32
    %c0_i32_1 = arith.constant 0 : i32
    %c0_i32_2 = arith.constant 0 : i32
    return %c0_i32, %c0_i32_0, %c0_i32_1 : i32, i32, i32
  }
}

</mosaic_0001>

<bundles_post_ra>
// kernel: frame_avg_pool.1
= control target key start
LH: loop header
LB: loop body
LE: loop exit
PB: predicated region body
PF: predicated region fallthrough
CT: control target
= control target key end

     0   :  { %vm78_vm0 = vcmask 261120   ;;  %s431_s28 = smov 16   ;;  %v432_v7 = vmov 0   ;;  %vm45_vm1 = vcmask 130048   ;;  %vm289_vm2 = vcmask 64512   ;;  %s434_s15 = smov 120   ;;  %s577_s0 = inlined_call_operand.vmem [shape: f32[2,32,16], index: 0, kind: input, shape index: {}]   ;;  %s578_s1 = inlined_call_operand.vmem [shape: f32[32,32], index: 1, kind: input, shape index: {}]   ;;  %s579_s2 = inlined_call_operand.vmem [shape: f32[32,1], index: 2, kind: input, shape index: {}]   ;;  %s580_s3 = inlined_call_operand.vmem [shape: f32[32,16], index: 3, kind: input, shape index: {}]   ;;  %s581_s4 = inlined_call_operand.vmem [shape: f32[32,8], index: 4, kind: input, shape index: {}]   ;;  %s582_s5 = inlined_call_operand.vmem [shape: f32[2,32,8], index: 5, kind: output, shape index: {}]  }
   0x1   :  { %v339_v0 = vld [vmem:[%s577_s0 + $0x20] sm:$0xff]  ;;  %v340_v1 = vld [vmem:[%s577_s0 + $0x28] sm:$0xff]  ;;  %v341_v2 = vld [vmem:[%s577_s0 + $0x30] sm:$0xff]  ;;  %429 = vset.pattern.permute.xlu1 %v432_v7  ;;  %430 = vset.pattern.permute.xlu0 %v432_v7 }
   0x2   :  { %v419_v3 = vpack.i.bf16 %v340_v1, %v339_v0  ;;  %v342_v4 = vld [vmem:[%s577_s0 + $0x38] sm:$0xff]  ;;  %v50_v5 = vld [vmem:[%s578_s1] sm:$0xff]  ;;  %v56_v9 = vld [vmem:[%s579_s2 + $0x10] sm:$0xff] }
   0x3   :  { %v424_v6 = vpack.i.bf16 %v342_v4, %v341_v2  ;;  %379 = vmatprep.mubr.msk.f32.mxu0 %vm78_vm0, %v50_v5  ;;  %v54_v8 = vld [vmem:[%s579_s2] sm:$0xff]  ;;  %v55_v10 = vld [vmem:[%s579_s2 + $0x8] sm:$0xff]  ;;  %v57_v11 = vld [vmem:[%s579_s2 + $0x18] sm:$0xff] }
   0x4   :  { %420 = vrot.lane.b32.xlu0 %v419_v3, %s431_s28  ;;  %60 = vperm.xlu1 %429, %v54_v8   ;;  %v180_v12 = vld [vmem:[%s580_s3] sm:$0xff]  ;;  %v181_v13 = vld [vmem:[%s580_s3 + $0x8] sm:$0xff]  ;;  %v22_v24 = vld [vmem:[%s577_s0 + $0x10] sm:$0xff] }
   0x5   :  { %v407_v14 = vpack.c.bf16 %v181_v13, %v180_v12  ;;  %v20_v16 = vld [vmem:[%s577_s0] sm:$0xff]  ;;  %v21_v17 = vld [vmem:[%s577_s0 + $0x8] sm:$0xff]  ;;  %v23_v25 = vld [vmem:[%s577_s0 + $0x18] sm:$0xff] }
   0x6   :  { %v51_v31 = vld [vmem:[%s578_s1 + $0x8] sm:$0xff]  ;;  %v52_v32 = vld [vmem:[%s578_s1 + $0x10] sm:$0xff]  ;;  %v53_v33 = vld [vmem:[%s578_s1 + $0x18] sm:$0xff]  ;;  %s433_s1 = smov 8  }
   0x7   :  { %408 = vmatprep.subr.bf16.mxu1 %v407_v14  ;;  %v182_v34 = vld [vmem:[%s580_s3 + $0x10] sm:$0xff]  ;;  %v183_v35 = vld [vmem:[%s580_s3 + $0x18] sm:$0xff]  ;;  %v282_v37 = vld [vmem:[%s581_s4 + $0x8] sm:$0xff] }
   0x8   :  { %425 = vrot.lane.b32.xlu0 %v424_v6, %s431_s28  ;;  %65 = vperm.xlu1 %429, %v55_v10   ;;  %v411_v36 = vpack.c.bf16 %v183_v35, %v182_v34  ;;  %v281_v38 = vld [vmem:[%s581_s4] sm:$0xff]  ;;  %v284_v39 = vld [vmem:[%s581_s4 + $0x18] sm:$0xff]  ;;  %v283_v40 = vld [vmem:[%s581_s4 + $0x10] sm:$0xff] }
   0x9   :  { %410 = vmatpush3.bf16.msra.mxu1 %v407_v14 }
   0xa   :  { %412 = vmatprep.subr.bf16.mxu1 %v411_v36 }
   0xc   :  { %70 = vperm.xlu0 %430, %v56_v9   ;;  %75 = vperm.xlu1 %429, %v57_v11  }
   0xd   :  { %414 = vmatpush3.bf16.msra.mxu1 %v411_v36 }
  0x10   :  { %300 = vrot.lane.b32.xlu0 %v282_v37, %s433_s1  ;;  %298 = vrot.lane.b32.xlu1 %v281_v38, %s433_s1 }
  0x14   :  { %304 = vrot.lane.b32.xlu0 %v284_v39, %s433_s1  ;;  %302 = vrot.lane.b32.xlu1 %v283_v40, %s433_s1 }
  0x76   :  { %v421_v15 = vpop.permute.xlu0 %420 }
  0x77   :  { %v423_v18 = vunpack.i.h.bf16 %v421_v15  ;;  %v422_v19 = vunpack.i.l.bf16 %v421_v15 }
  0x79   :  { %v46_v20 = vsel %vm45_vm1, %v20_v16, %v422_v19  ;;  %v47_v21 = vsel %vm45_vm1, %v21_v17, %v423_v18 }
  0x7a   :  { %v426_v22 = vpop.permute.xlu0 %425  ;;  %v399_v23 = vpack.c.bf16 %v47_v21, %v46_v20 }
  0x7b   :  { %v428_v26 = vunpack.i.h.bf16 %v426_v22  ;;  %v427_v27 = vunpack.i.l.bf16 %v426_v22 }
  0x7c   :  { %400 = vmatprep.subr.bf16.mxu0 %v399_v23 }
  0x7d   :  { %402 = vmatpush3.bf16.msra.mxu0 %v399_v23  ;;  %v48_v28 = vsel %vm45_vm1, %v22_v24, %v427_v27  ;;  %v49_v29 = vsel %vm45_vm1, %v23_v25, %v428_v26 }
  0x7e   :  { %v403_v30 = vpack.c.bf16 %v49_v29, %v48_v28 }
  0x80   :  { %404 = vmatprep.subr.bf16.mxu0 %v403_v30 }
  0x81   :  { %406 = vmatpush3.bf16.msra.mxu0 %v403_v30 }
  0x83   :  { %v61_v41 = vpop.permute.xlu1 %60 }
  0x84   :  { %380 = vmatmul.mubr.msk.f32.vlgmr.msra.gmra.mrb[0].mxu0 %vm78_vm0, %v51_v31 }
  0x85   :  { %382 = vmatprep.mubr.msk.f32.mxu0 %vm78_vm0, %v52_v32 }
  0x87   :  { %v66_v42 = vpop.permute.xlu1 %65 }
  0x88   :  { %383 = vmatmul.mubr.msk.f32.gmra.mrb[2].mxu0 %vm78_vm0, %v53_v33 }
  0x8b   :  { %v71_v47 = vpop.permute.xlu0 %70  ;;  %v76_v48 = vpop.permute.xlu1 %75 }
  0x8f   :  { %v301_v57 = vpop.permute.xlu0 %300  ;;  %v299_v58 = vpop.permute.xlu1 %298 }
  0x93   :  { %v305_v1 = vpop.permute.xlu0 %304  ;;  %v303_v2 = vpop.permute.xlu1 %302 }
 0x157   :  { %v381_v43 = vpop.f32.mrb[0].mxu0 }
 0x158   :  { %v163_v44 = vadd.f32 %v381_v43, %v66_v42  ;;  %v157_v45 = vpop.f32.mrb[1].mxu0 }
 0x159   :  { %v158_v46 = vadd.f32 %v157_v45, %v61_v41 }
 0x15a   :  { %v177_v51 = vmax.f32 %v163_v44, 0.0 }
 0x15b   :  { %v176_v49 = vmax.f32 %v158_v46, 0.0  ;;  %v384_v50 = vpop.f32.mrb[2].mxu0 }
 0x15c   :  { %v173_v52 = vadd.f32 %v384_v50, %v76_v48  ;;  %v167_v53 = vpop.f32.mrb[3].mxu0 }
 0x15d   :  { %v168_v54 = vadd.f32 %v167_v53, %v71_v47  ;;  %393 = vmatprep.mubr.msk.f32.mxu1 %vm78_vm0, %v176_v49 }
 0x15e   :  { %394 = vmatmul.mubr.msk.f32.vlgmr.msra.gmra.mrb[0].mxu1 %vm78_vm0, %v177_v51  ;;  %v179_v56 = vmax.f32 %v173_v52, 0.0 }
 0x15f   :  { %v178_v55 = vmax.f32 %v168_v54, 0.0 }
 0x161   :  { %396 = vmatprep.mubr.msk.f32.mxu1 %vm78_vm0, %v178_v55 }
 0x162   :  { %397 = vmatmul.mubr.msk.f32.gmra.mrb[2].mxu1 %vm78_vm0, %v179_v56 }
 0x231   :  { %v395_v59 = vpop.f32.mrb[0].mxu1 }
 0x232   :  { %v286_v60 = vadd.f32 %v395_v59, %v282_v37  ;;  %v311_v61 = vadd.f32 %v395_v59, %v301_v57  ;;  %v262_v62 = vpop.f32.mrb[1].mxu1 }
 0x233   :  { %v285_v63 = vadd.f32 %v281_v38, %v262_v62  ;;  %v310_v0 = vadd.f32 %v299_v58, %v262_v62 }
 0x234   :  { %291 = vst.msk [vmem:[%s582_s5 + $0x8] sm:$0xff] %vm289_vm2, %v286_v60  ;;  %320 = vrot.lane.b32.xlu0 %v311_v61, %s434_s15 }
 0x235   :  { %290 = vst.msk [vmem:[%s582_s5] sm:$0xff] %vm289_vm2, %v285_v63  ;;  %318 = vrot.lane.b32.xlu1 %v310_v0, %s434_s15  ;;  %v398_v3 = vpop.f32.mrb[2].mxu1 }
 0x236   :  { %v288_v4 = vadd.f32 %v398_v3, %v284_v39  ;;  %v313_v5 = vadd.f32 %v398_v3, %v305_v1  ;;  %v272_v6 = vpop.f32.mrb[3].mxu1 }
 0x237   :  { %v287_v7 = vadd.f32 %v283_v40, %v272_v6  ;;  %v312_v8 = vadd.f32 %v303_v2, %v272_v6 }
 0x238   :  { %293 = vst.msk [vmem:[%s582_s5 + $0x18] sm:$0xff] %vm289_vm2, %v288_v4  ;;  %324 = vrot.lane.b32.xlu0 %v313_v5, %s434_s15 }
 0x239   :  { %292 = vst.msk [vmem:[%s582_s5 + $0x10] sm:$0xff] %vm289_vm2, %v287_v7  ;;  %322 = vrot.lane.b32.xlu1 %v312_v8, %s434_s15 }
 0x2a6   :  { %v321_v9 = vpop.permute.xlu0 %320 }
 0x2a7   :  { %352 = vst.msk [vmem:[%s582_s5 + $0x28] sm:$0xff] %vm289_vm2, %v321_v9  ;;  %v319_v10 = vpop.permute.xlu1 %318 }
 0x2a8   :  { %351 = vst.msk [vmem:[%s582_s5 + $0x20] sm:$0xff] %vm289_vm2, %v319_v10 }
 0x2aa   :  { %v325_v11 = vpop.permute.xlu0 %324 }
 0x2ab   :  { %354 = vst.msk [vmem:[%s582_s5 + $0x38] sm:$0xff] %vm289_vm2, %v325_v11  ;;  %v323_v12 = vpop.permute.xlu1 %322 }
 0x2ac   :  { %353 = vst.msk [vmem:[%s582_s5 + $0x30] sm:$0xff] %vm289_vm2, %v323_v12 }

</bundles_post_ra>
